<compile_context>
chip_gen: v7x
topology: tpu7x:2x2x1
jax: 0.10.0
libtpu: 0.0.40
codegen_flags: <defaults>
</compile_context>

<pallas_src>
import jax
import jax.numpy as jnp
from jax import lax
from jax.experimental import pallas as pl
from jax.experimental.pallas import tpu as pltpu


def _mlp_kernel(x_ref, w_ref, b_ref, o_ref):
    # x_ref: (1, C, TN)   w_ref: (C, E)   b_ref: (1, E)   o_ref: (1, TN, E)
    # Contract C of x (dim 0) against C of w (dim 0)  ->  (TN, E).
    y = lax.dot_general(
        x_ref[0],
        w_ref[...],
        dimension_numbers=(((0,), (0,)), ((), ())),
        preferred_element_type=jnp.float32,
    )
    y = y + b_ref[...].astype(jnp.float32)          # broadcast (1, E)
    o_ref[0] = y.astype(o_ref.dtype)


def _round_up(x, m):
    return ((x + m - 1) // m) * m


def _vmem_capacity_bytes(default=64 << 20):
    """Physical per-core VMEM (generation-aware); conservative fallback."""
    try:
        info = pltpu.get_tpu_info()
        cap = getattr(info, "vmem_capacity_bytes", None)
        if cap:
            return int(cap)
    except Exception:
        pass
    return default


def _choose_tn(C, E, in_item, out_item, n_ceil, tile_budget, *,
               max_tn=8192, min_dma_bytes=1 << 20):
    """Largest 128-multiple token tile whose double-buffered working set fits
    `tile_budget`, subject to a per-step DMA byte floor (amortizes the
    ~0.35 us/step grid overhead)."""
    per_tok_vmem = 2 * (C * in_item + E * out_item)   # dbl-buffered x + out tile rows
    per_tok_dma = C * in_item + E * out_item          # HBM bytes moved per token
    fixed = 2 * (C * E * in_item + E * out_item)      # dbl-buffered weight + bias
    avail = max(tile_budget - fixed, 128 * per_tok_vmem)
    tn_vmem = max(128, (avail // per_tok_vmem) // 128 * 128)   # VMEM ceiling
    tn_floor = _round_up(pl.cdiv(min_dma_bytes, per_tok_dma), 128)  # DMA floor
    tn = max(min(max_tn, tn_vmem), min(tn_floor, tn_vmem))
    return max(128, min(tn, n_ceil))


def mlp_forward(x_nchw, weight, bias, *, use_bf16_inputs=False):
    """x_nchw: (B, C, H, W); weight: (E, C) as in nn.Linear; bias: (E,)."""
    B, C, H, W = x_nchw.shape
    E = weight.shape[0]
    N = H * W
    out_dtype = x_nchw.dtype

    # flatten(2) is a free reshape; no transpose of x (fused into the kernel).
    x_bcn = x_nchw.reshape(B, C, N)
    w_ce = weight.T                 # (C, E): contraction-ready, loaded once
    b_1e = bias.reshape(1, E)

    if use_bf16_inputs:
        # Opt-in: halves input HBM traffic of this bandwidth-bound op; the MXU
        # still accumulates in f32 but numerics differ from the f32 module.
        x_bcn = x_bcn.astype(jnp.bfloat16)
        w_ce = w_ce.astype(jnp.bfloat16)

    in_item = jnp.dtype(x_bcn.dtype).itemsize
    out_item = jnp.dtype(out_dtype).itemsize

    vmem_phys = _vmem_capacity_bytes()
    tile_budget = vmem_phys // 2                      # ~64 MiB v5e/v6e, ~32 MiB v7x
    vmem_limit = int(min(vmem_phys * 3 // 4, tile_budget + (16 << 20)))

    n_ceil = _round_up(N, 128)
    tn = _choose_tn(C, E, in_item, out_item, n_ceil, tile_budget)
    if B == 1:
        # Keep >= 2 token tiles so both v7x TensorCores share the parallel grid.
        tn = max(128, min(tn, _round_up(pl.cdiv(N, 2), 128)))

    grid = (B, pl.cdiv(N, tn))                        # edge blocks are masked

    cost = pl.CostEstimate(
        flops=2 * B * N * C * E,
        transcendentals=0,
        bytes_accessed=(B * N * C + C * E) * in_item + (B * N * E + E) * out_item,
    )

    return pl.pallas_call(
        _mlp_kernel,
        out_shape=jax.ShapeDtypeStruct((B, N, E), out_dtype),
        grid_spec=pltpu.PrefetchScalarGridSpec(
            num_scalar_prefetch=0,
            grid=grid,
            in_specs=[
                pl.BlockSpec((1, C, tn), lambda b, n: (b, 0, n)),
                pl.BlockSpec((C, E), lambda b, n: (0, 0)),
                pl.BlockSpec((1, E), lambda b, n: (0, 0)),
            ],
            out_specs=pl.BlockSpec((1, tn, E), lambda b, n: (b, n, 0)),
        ),
        compiler_params=pltpu.CompilerParams(
            dimension_semantics=("parallel", "parallel"),
            vmem_limit_bytes=vmem_limit,
        ),
        cost_estimate=cost,
    )(x_bcn, w_ce, b_1e)


if __name__ == "__main__":
    # Small shapes consistent with the module (input_dim=C, embed_dim=E).
    B, C, H, W = 2, 16, 16, 16       # N = 256
    E = 32

    key = jax.random.PRNGKey(0)
    kx, kw, kb = jax.random.split(key, 3)
    x = jax.random.normal(kx, (B, C, H, W), dtype=jnp.float32)
    # nn.Linear parameters: weight (E, C), bias (E,).
    weight = jax.random.normal(kw, (E, C), dtype=jnp.float32) * 0.02
    bias = jax.random.normal(kb, (E,), dtype=jnp.float32) * 0.01

    def ref_fn(xx):
        b_, c_, h_, w_ = xx.shape
        xb = jnp.transpose(xx.reshape(b_, c_, h_ * w_), (0, 2, 1))
        return jnp.einsum("bnc,ec->bne", xb, weight) + bias

    out = mlp_forward(x, weight, bias)
    jax.block_until_ready(out)
    assert out.shape == (B, H * W, E)
    assert jnp.allclose(out, ref_fn(x), atol=1e-5, rtol=1e-5)

    # Ragged spatial size (H*W = 100, not a multiple of 128): exercises the
    # masked partial edge block on both the input and output token axis
    # (no jnp.pad / trailing slice anymore).
    x2 = jax.random.normal(kx, (B, C, 10, 10), dtype=jnp.float32)
    out2 = mlp_forward(x2, weight, bias)
    jax.block_until_ready(out2)
    assert out2.shape == (B, 100, E)
    assert jnp.allclose(out2, ref_fn(x2), atol=1e-5, rtol=1e-5)

    # B == 1: exercises the >=2-token-tile split (keeps both v7x TCs busy)
    # plus a partial edge tile (400 = 256 + 144).
    x3 = jax.random.normal(kx, (1, C, 20, 20), dtype=jnp.float32)
    out3 = mlp_forward(x3, weight, bias)
    jax.block_until_ready(out3)
    assert out3.shape == (1, 400, E)
    assert jnp.allclose(out3, ref_fn(x3), atol=1e-5, rtol=1e-5)

    # Opt-in bf16-input path (halves input HBM traffic; looser tolerance).
    out_bf16 = mlp_forward(x, weight, bias, use_bf16_inputs=True)
    jax.block_until_ready(out_bf16)
    assert out_bf16.shape == (B, H * W, E)
    assert jnp.allclose(out_bf16, ref_fn(x), atol=5e-2, rtol=5e-2)

    print("KERNEL_OK")
</pallas_src>

<mosaic_0001>
module attributes {stable_mosaic.version = 11 : i64} {
  func.func @_mlp_kernel(%arg0: i32, %arg1: i32, %arg2: memref<1x16x256xf32, #tpu.memory_space<vmem>>, %arg3: memref<16x32xf32, #tpu.memory_space<vmem>>, %arg4: memref<1x32xf32, #tpu.memory_space<vmem>>, %arg5: memref<1x256x32xf32, #tpu.memory_space<vmem>>) attributes {dimension_semantics = [#tpu.dimension_semantics<parallel>, #tpu.dimension_semantics<parallel>], iteration_bounds = array<i64: 2, 1>, scalar_prefetch = 0 : i64, scratch_operands = 0 : i64, tpu.core_type = #tpu.core_type<tc>, window_params = [{transform_indices = @transform_0, window_bounds = array<i64: 1, 16, 256>}, {pipeline_mode = #tpu.pipeline_mode<synchronous>, transform_indices = @transform_1, window_bounds = array<i64: 16, 32>}, {pipeline_mode = #tpu.pipeline_mode<synchronous>, transform_indices = @transform_2, window_bounds = array<i64: 1, 32>}, {transform_indices = @transform_3, window_bounds = array<i64: 1, 256, 32>}]} {
    %c0 = arith.constant 0 : index
    %c0_0 = arith.constant 0 : index
    %c0_1 = arith.constant 0 : index
    %0 = vector.load %arg2[%c0, %c0_0, %c0_1] : memref<1x16x256xf32, #tpu.memory_space<vmem>>, vector<1x16x256xf32>
    %1 = vector.shape_cast %0 : vector<1x16x256xf32> to vector<16x256xf32>
    %c0_2 = arith.constant 0 : index
    %c0_3 = arith.constant 0 : index
    %2 = vector.load %arg3[%c0_2, %c0_3] : memref<16x32xf32, #tpu.memory_space<vmem>>, vector<16x32xf32>
    %cst = arith.constant dense<0.000000e+00> : vector<256x32xf32>
    %3 = tpu.matmul %1, %2, %cst {dimension_numbers = #tpu.dot_dimension_numbers<[0], [0], [1], [1], [0, 1, 1, 1], [], []>} : vector<16x256xf32>, vector<16x32xf32>, vector<256x32xf32> -> vector<256x32xf32>
    %c0_4 = arith.constant 0 : index
    %c0_5 = arith.constant 0 : index
    %4 = vector.load %arg4[%c0_4, %c0_5] : memref<1x32xf32, #tpu.memory_space<vmem>>, vector<1x32xf32>
    %5 = vector.broadcast %4 : vector<1x32xf32> to vector<256x32xf32>
    %6 = arith.addf %3, %5 : vector<256x32xf32>
    %c0_6 = arith.constant 0 : index
    %c0_7 = arith.constant 0 : index
    %c0_8 = arith.constant 0 : index
    %7 = vector.load %arg5[%c0_6, %c0_7, %c0_8] : memref<1x256x32xf32, #tpu.memory_space<vmem>>, vector<1x256x32xf32>
    %8 = vector.shape_cast %7 : vector<1x256x32xf32> to vector<256x32xf32>
    %9 = vector.shape_cast %6 : vector<256x32xf32> to vector<1x256x32xf32>
    tpu.vector_store %arg5[%c0_6, %c0_7, %c0_8], %9 {strides = array<i32>} : memref<1x256x32xf32, #tpu.memory_space<vmem>>, vector<1x256x32xf32>,
    return
  }
  func.func @transform_0(%arg0: i32, %arg1: i32) -> (i32, i32, i32) {
    %c0_i32 = arith.constant 0 : i32
    %c0_i32_0 = arith.constant 0 : i32
    return %arg0, %c0_i32, %arg1 : i32, i32, i32
  }
  func.func @transform_1(%arg0: i32, %arg1: i32) -> (i32, i32) {
    %c0_i32 = arith.constant 0 : i32
    %c0_i32_0 = arith.constant 0 : i32
    %c0_i32_1 = arith.constant 0 : i32
    return %c0_i32, %c0_i32_0 : i32, i32
  }
  func.func @transform_2(%arg0: i32, %arg1: i32) -> (i32, i32) {
    %c0_i32 = arith.constant 0 : i32
    %c0_i32_0 = arith.constant 0 : i32
    %c0_i32_1 = arith.constant 0 : i32
    return %c0_i32, %c0_i32_0 : i32, i32
  }
  func.func @transform_3(%arg0: i32, %arg1: i32) -> (i32, i32, i32) {
    %c0_i32 = arith.constant 0 : i32
    %c0_i32_0 = arith.constant 0 : i32
    return %arg0, %arg1, %c0_i32 : i32, i32, i32
  }
}

</mosaic_0001>

<bundles_post_ra>
// kernel: tpu_custom_call.1
= control target key start
LH: loop header
LB: loop body
LE: loop exit
PB: predicated region body
PF: predicated region fallthrough
CT: control target
= control target key end

     0   :  { %8 = vsyncpa [#allocation3], 0  ;;  %s1417_s0 = inlined_call_operand.hbm [shape: f32[2,16,256], index: 0, kind: input, shape index: {}]   ;;  %s1418_s1 = inlined_call_operand.hbm [shape: f32[16,32], index: 1, kind: input, shape index: {}]   ;;  %s1419_s2 = inlined_call_operand.vmem [shape: f32[1,32], index: 2, kind: input, shape index: {}]   ;;  %s1420_s3 = inlined_call_operand.vmem [shape: f32[2,256,32], index: 3, kind: output, shape index: {}]  }
   0x1   :  { %10 = vsyncpa [#allocation3 + $0x1], 0 }
   0x2   :  { %11 = vsyncpa [#allocation5], 0  ;;  %s1124_s12 = smov 0   ;;  %s1126_s13 = smov 0  }
   0x3   :  { %s1128_s14 = smov 0   ;;  %s1130_s15 = smov 0  }
   0x4   :  { %s1132_s16 = smov 0   ;;  %s1134_s17 = smov 0  }
   0x5 LB: > { %s771_s18 = sadd.s32 4294967295, %s1096_s17   ;;  %p51_p0 = scmp.ne.s32.totalorder %s1080_s13, %s1076_s12  ;;  %s1096_s17 = sphi %s1134_s17, %s17_s17   ;;  %s1092_s16 = sphi %s1132_s16, %s1437_s16   ;;  %s1088_s15 = sphi %s1130_s15, %s1436_s15   ;;  %s1084_s14 = sphi %s1128_s14, %s1435_s14   ;;  %s1080_s13 = sphi %s1126_s13, %s1434_s13   ;;  %s1076_s12 = sphi %s1124_s12, %s1433_s12  }
   0x6   : > { %p1154_p1 = scmp.eq.s32.totalorder %s771_s18, 0  ;;  %p773_p2 = scmp.ge.s32.totalorder %s1096_s17, 1 }
   0x7   : > { %p132_p3 = scmp.lt.s32.totalorder %s1096_s17, 3  ;;  %s1098_s22 = smov [#allocation4]  }
   0x8   : > { %s1425_s19 = scalar_select %p1154_p1, 1, 0 }
   0x9   : > { %p1162_p4 = por %p1154_p1, %p51_p0  ;;  %p1166_p5 = pnand %p773_p2, %p132_p3 }
   0xa   : > { %s144_s23 = sshll.u32 %s1098_s22, 4  ;;  %s29_s25 = sadd.s32 1, %s1092_s16  ;;  %s145_s23 = int_to_ptr.vmem [resolvable:$true] %s144_s23 }
   0xb   : > { %s1426_s20 = scalar_select %p1162_p4, 1, 0 }
   0xc   : > { %s1427_s21 = scalar_select %p1166_p5, 1, 0 }
   0xd   : > { %p919_p6 = pneg %p1166_p5  ;;  %s984_s28 = scalar_lea.hbm %s1418_s1, 256 }
   0xe   : > { %p985_p8 = scmp.ne.s32.totalorder %s1418_s1, %s984_s28  ;;  %p991_p12 = scmp.lt.u32.totalorder %s984_s28, %s1418_s1 }
   0xf   : > { %p1174_p7 = pnand %p919_p6, %p1154_p1 }
  0x11   : > { %p986_p9 = pneg %p1174_p7 }
  0x13   : > { %p987_p10 = pnand %p986_p9, %p985_p8 }
  0x15   : > { %p988_p11 = pneg %p987_p10 }
  0x17   : > { %p993_p13 = pnand %p991_p12, %p988_p11 }
  0x19   : > { %996 = shalt.err (!%p993_p13)
}
  0x1a   : > { %s997_s6 = scalar_lea.vmem %s145_s23, 256  ;;  %p1005_p6 = scmp.lt.s32.totalorder %s145_s23, %s145_s23 }
  0x1b   : > { %p998_p0 = scmp.ne.s32.totalorder %s145_s23, %s997_s6  ;;  %p1006_p1 = scmp.lt.s32.totalorder %s997_s6, %s997_s6 }
  0x1d   : > { %p1000_p2 = pnand %p998_p0, %p986_p9  ;;  %p1007_p4 = por %p1006_p1, %p1005_p6 }
  0x1f   : > { %p1001_p3 = pneg %p1000_p2 }
  0x21   : > { %p1008_p5 = pnand %p1007_p4, %p1001_p3 }
  0x23   : > { %1011 = shalt.err (!%p1008_p5)
}
  0x24   : > { %s1099_s7 = smov 128   ;;  %s1100_s8 = smov 8  }
  0x25   : > { %922 = dma.hbm_to_vmem [thread:$0]  (!%p1174_p7), %s1418_s1, 256, %s145_s23, [#allocation5], %s1099_s7, %s1099_s7, %s1100_s8  }
  0x26   : > { %p31_p1 = scmp.ge.s32.totalorder %s29_s25, 2  ;;  %s38_s11 = sadd.s32 1, %s1084_s14 }
  0x27   : > { %p45_p4 = scmp.ne.s32.totalorder %s1084_s14, %s1080_s13  ;;  %p46_p5 = scmp.eq.s32.totalorder %s1096_s17, 0 }
  0x28   : > { %s1439_s25 = smov (%p31_p1, %s29_s25), 0  ;;  %p928_p9 = scmp.lt.s32.totalorder %s1096_s17, 2 }
  0x29   : > { %p47_p8 = por %p46_p5, %p45_p4  ;;  %s33_s12 = ssub.s32 %s1092_s16, %s1439_s25 }
  0x2a   : > { %s161_s18 = sand.u32 1, %s1084_s14   ;;  %p36_p10 = scmp.eq.s32.totalorder %s33_s12, 0 }
  0x2b   : > { %s776_s22 = sshll.u32 %s161_s18, 5  ;;  %s819_s26 = sshll.u32 %s1092_s16, 9 }
  0x2c   : > { %s1207_s27 = scalar_select %p36_p10, %s1084_s14, %s38_s11  }
  0x2d   : > { %s1212_s23 = scalar_lea.hbm %s1417_s0, %s819_s26  ;;  %s165_s29 = scalar_lea.vmem [#allocation2], %s776_s22 }
  0x2e   : > { %s174_s30 = sshll.u32 %s165_s29, 4  ;;  %p1214_p7 = pnand %p928_p9, %p47_p8  ;;  %s1218_s30 = int_to_ptr.vmem [resolvable:$true] %s174_s30 }
  0x2f   : > { %s1220_s5 = scalar_lea.sflag [#allocation3], %s161_s18  ;;  %s1012_s6 = scalar_lea.hbm %s1212_s23, 512 }
  0x30   : > { %p1013_p11 = scmp.ne.s32.totalorder %s1212_s23, %s1012_s6  ;;  %p1014_p12 = pneg %p1214_p7 }
  0x31   : > { %s1017_s9 = scalar_lea.hbm %s1417_s0, 1024  ;;  %p1018_p2 = scmp.lt.u32.totalorder %s1212_s23, %s1417_s0 }
  0x32   : > { %p1015_p13 = pnand %p1014_p12, %p1013_p11  ;;  %p1019_p3 = scmp.lt.u32.totalorder %s1017_s9, %s1012_s6 }
  0x33   : > { %p1021_p1 = scmp.lt.u32.totalorder %s1012_s6, %s1212_s23 }
  0x34   : > { %p1016_p0 = pneg %p1015_p13  ;;  %p1020_p6 = por %p1019_p3, %p1018_p2 }
  0x36   : > { %p1022_p4 = por %p1021_p1, %p1020_p6 }
  0x38   : > { %p1023_p5 = pnand %p1022_p4, %p1016_p0 }
  0x3a   : > { %1026 = shalt.err (!%p1023_p5)
}
  0x3b   : > { %s1027_s12 = scalar_lea.vmem %s1218_s30, 512  ;;  %s1101_s18 = smov [#allocation2]  }
  0x3c   : > { %p1028_p8 = scmp.ne.s32.totalorder %s1218_s30, %s1027_s12  ;;  %s1032_s22 = sshll.u32 %s1101_s18, 4  ;;  %s1033_s22 = int_to_ptr.vmem [resolvable:$false] %s1032_s22 }
  0x3d   : > { %s1034_s26 = scalar_lea.vmem %s1033_s22, 1024  ;;  %p1035_p11 = scmp.lt.s32.totalorder %s1218_s30, %s1033_s22 }
  0x3e   : > { %p1030_p9 = pnand %p1028_p8, %p1014_p12  ;;  %p1036_p13 = scmp.lt.s32.totalorder %s1034_s26, %s1027_s12 }
  0x40   : > { %p1031_p10 = pneg %p1030_p9  ;;  %p1037_p2 = por %p1036_p13, %p1035_p11 }
  0x42   : > { %p1038_p3 = pnand %p1037_p2, %p1031_p10 }
  0x44   : > { %1041 = shalt.err (!%p1038_p3)
}
  0x45   : > { %s1102_s24 = smov 256   ;;  %s1103_s28 = smov 16  }
  0x46   : > { %926 = dma.hbm_to_vmem [thread:$0]  (!%p1214_p7), %s1212_s23, 512, %s1218_s30, %s1220_s5, %s1102_s24, %s1102_s24, %s1103_s28  }
  0x47   : > { %p1430_p12 = scmp.ne.s32.totalorder %s1427_s21, 0 }
  0x48   : > { %s188_s29 = sand.u32 (!%p1430_p12), 1, %s1080_s13   ;;  %p1431_p0 = scmp.ne.s32.totalorder (!%p1430_p12), %s1426_s20, 0 }
  0x49   : > { %186 = sbr.rel (%p1430_p12) target bundleno = 490 (0x1ea), region = 32  ;;  %s780_s6 = sshll.u32 (!%p1430_p12), %s188_s29, 5 }
  0x4a   : > { %s189_s7 = scalar_lea.sflag (!%p1430_p12), [#allocation3], %s188_s29  ;;  %s192_s8 = scalar_lea.vmem (!%p1430_p12), [#allocation2], %s780_s6 }
  0x50   : > { %1067 = dma.done.wait (%p1431_p0), %s189_s7, 512  }
  0x51   : > { %1069 = vsyncadd (%p1431_p0), %s189_s7, 4294966784  ;;  %p1432_p6 = scmp.ne.s32.totalorder %s1425_s19, 0 }
  0x53   : > { %1071 = dma.done.wait (%p1432_p6), [#allocation5], 256  }
  0x54   : > { %1073 = vsyncadd (%p1432_p6), [#allocation5], 4294967040  ;;  %v235_v0 = vld [vmem:[%s192_s8 + $0x8] sm:$0xff]  ;;  %v234_v1 = vld [vmem:[%s192_s8] sm:$0xff]  ;;  %vm311_vm0 = vcmask 130048   ;;  %p225_p7 = scmp.lt.s32.totalorder %s1088_s15, 1 }
  0x55   : > { %279 = vxpose.xlu1.b32.start [1/2] (short) %v235_v0, 128  ;;  %247 = vxpose.xlu0.b32.start [1/2] (short) %v234_v1, 128  ;;  %v238_v2 = vld [vmem:[#allocation4] sm:$0xff]  ;;  %v239_v3 = vld [vmem:[#allocation4 + $0x8] sm:$0xff]  ;;  %v237_v4 = vld [vmem:[%s192_s8 + $0x18] sm:$0xff]  ;;  %vm633_vm1 = vcmask 261120  }
  0x56   : > { %v236_v5 = vld [vmem:[%s192_s8 + $0x10] sm:$0xff]  ;;  %v907_v6 = vpack.c.bf16 %v239_v3, %v238_v2  ;;  %s1441_s15 = smov (!%p225_p7, %s1088_s15), 1  ;;  %v1296_v39 = vld [vmem:[%s1419_s2] ss:$0 sm:$0xff] }
  0x57   : > { %s820_s19 = sshll.u32 %s1441_s15, 8 }
  0x58   : > { %908 = vmatprep.subr.bf16.mxu0 %v907_v6  ;;  %911 = vmatprep.subr.bf16.mxu1 %v907_v6  ;;  %s1301_s4 = scalar_lea.vmem %s1420_s3, %s820_s19 }
  0x59   : > { %280 = vxpose.xlu1.b32.end [2/2] (short) %v237_v4, 128  ;;  %248 = vxpose.xlu0.b32.end [2/2] (short) %v236_v5, 128 }
  0x5a   : > { %910 = vmatpush3.bf16.msra.mxu0 %v907_v6  ;;  %912 = vmatpush3.bf16.msra.mxu1 %v907_v6 }
  0xd5   : > { %v295_v7 = vpop.trf.xlu1  ;;  %v263_v8 = vpop.trf.xlu0 }
  0xd6   : > { %859 = vmatprep.mubr.msk.f32.mxu0 %vm311_vm0, %v263_v8  ;;  %883 = vmatprep.mubr.msk.f32.mxu1 %vm311_vm0, %v295_v7 }
  0xd9   : > { %v296_v9 = vpop.trf.xlu1  ;;  %v264_v10 = vpop.trf.xlu0 }
  0xda   : > { %860 = vmatmul.mubr.msk.f32.vlgmr.msra.gmra.mrb[0].mxu0 %vm311_vm0, %v264_v10  ;;  %884 = vmatmul.mubr.msk.f32.vlgmr.msra.gmra.mrb[0].mxu1 %vm311_vm0, %v296_v9 }
  0xdd   : > { %v297_v11 = vpop.trf.xlu1  ;;  %v265_v12 = vpop.trf.xlu0 }
  0xde   : > { %862 = vmatprep.mubr.msk.f32.mxu0 %vm311_vm0, %v265_v12  ;;  %886 = vmatprep.mubr.msk.f32.mxu1 %vm311_vm0, %v297_v11 }
  0xe1   : > { %v298_v13 = vpop.trf.xlu1  ;;  %v266_v14 = vpop.trf.xlu0 }
  0xe2   : > { %863 = vmatmul.mubr.msk.f32.gmra.mrb[2].mxu0 %vm311_vm0, %v266_v14  ;;  %887 = vmatmul.mubr.msk.f32.gmra.mrb[2].mxu1 %vm311_vm0, %v298_v13 }
  0xe5   : > { %v299_v15 = vpop.trf.xlu1  ;;  %v267_v16 = vpop.trf.xlu0 }
  0xe6   : > { %865 = vmatprep.mubr.msk.f32.mxu0 %vm311_vm0, %v267_v16  ;;  %889 = vmatprep.mubr.msk.f32.mxu1 %vm311_vm0, %v299_v15 }
  0xe9   : > { %v300_v17 = vpop.trf.xlu1  ;;  %v268_v18 = vpop.trf.xlu0 }
  0xea   : > { %866 = vmatmul.mubr.msk.f32.gmra.mrb[4].mxu0 %vm311_vm0, %v268_v18  ;;  %890 = vmatmul.mubr.msk.f32.gmra.mrb[4].mxu1 %vm311_vm0, %v300_v17 }
  0xed   : > { %v301_v19 = vpop.trf.xlu1  ;;  %v269_v20 = vpop.trf.xlu0 }
  0xee   : > { %868 = vmatprep.mubr.msk.f32.mxu0 %vm311_vm0, %v269_v20  ;;  %892 = vmatprep.mubr.msk.f32.mxu1 %vm311_vm0, %v301_v19 }
  0xf1   : > { %v302_v21 = vpop.trf.xlu1  ;;  %v270_v22 = vpop.trf.xlu0 }
  0xf2   : > { %869 = vmatmul.mubr.msk.f32.gmra.mrb[6].mxu0 %vm311_vm0, %v270_v22  ;;  %893 = vmatmul.mubr.msk.f32.gmra.mrb[6].mxu1 %vm311_vm0, %v302_v21 }
  0xf5   : > { %v303_v23 = vpop.trf.xlu1  ;;  %v271_v24 = vpop.trf.xlu0 }
  0xf6   : > { %871 = vmatprep.mubr.msk.f32.mxu0 %vm311_vm0, %v271_v24  ;;  %895 = vmatprep.mubr.msk.f32.mxu1 %vm311_vm0, %v303_v23 }
  0xf9   : > { %v304_v25 = vpop.trf.xlu1  ;;  %v272_v26 = vpop.trf.xlu0 }
  0xfa   : > { %872 = vmatmul.mubr.msk.f32.gmra.mrb[8].mxu0 %vm311_vm0, %v272_v26  ;;  %896 = vmatmul.mubr.msk.f32.gmra.mrb[8].mxu1 %vm311_vm0, %v304_v25 }
  0xfd   : > { %v305_v27 = vpop.trf.xlu1  ;;  %v273_v28 = vpop.trf.xlu0 }
  0xfe   : > { %874 = vmatprep.mubr.msk.f32.mxu0 %vm311_vm0, %v273_v28  ;;  %898 = vmatprep.mubr.msk.f32.mxu1 %vm311_vm0, %v305_v27 }
 0x101   : > { %v306_v29 = vpop.trf.xlu1  ;;  %v274_v30 = vpop.trf.xlu0 }
 0x102   : > { %875 = vmatmul.mubr.msk.f32.gmra.mrb[10].mxu0 %vm311_vm0, %v274_v30  ;;  %899 = vmatmul.mubr.msk.f32.gmra.mrb[10].mxu1 %vm311_vm0, %v306_v29 }
 0x105   : > { %v307_v31 = vpop.trf.xlu1  ;;  %v275_v32 = vpop.trf.xlu0 }
 0x106   : > { %877 = vmatprep.mubr.msk.f32.mxu0 %vm311_vm0, %v275_v32  ;;  %901 = vmatprep.mubr.msk.f32.mxu1 %vm311_vm0, %v307_v31 }
 0x109   : > { %v308_v33 = vpop.trf.xlu1  ;;  %v276_v34 = vpop.trf.xlu0 }
 0x10a   : > { %878 = vmatmul.mubr.msk.f32.gmra.mrb[12].mxu0 %vm311_vm0, %v276_v34  ;;  %902 = vmatmul.mubr.msk.f32.gmra.mrb[12].mxu1 %vm311_vm0, %v308_v33 }
 0x10d   : > { %v309_v35 = vpop.trf.xlu1  ;;  %v277_v36 = vpop.trf.xlu0 }
 0x10e   : > { %880 = vmatprep.mubr.msk.f32.mxu0 %vm311_vm0, %v277_v36  ;;  %904 = vmatprep.mubr.msk.f32.mxu1 %vm311_vm0, %v309_v35 }
 0x111   : > { %v310_v37 = vpop.trf.xlu1  ;;  %v278_v38 = vpop.trf.xlu0 }
 0x112   : > { %881 = vmatmul.mubr.msk.f32.gmra.mrb[14].mxu0 %vm311_vm0, %v278_v38  ;;  %905 = vmatmul.mubr.msk.f32.gmra.mrb[14].mxu1 %vm311_vm0, %v310_v37 }
 0x1ad   : > { %v861_v40 = vpop.f32.mrb[0].mxu0  ;;  %v885_v41 = vpop.f32.mrb[0].mxu1 }
 0x1ae   : > { %v480_v42 = vadd.f32 %v861_v40, %v1296_v39  ;;  %v560_v43 = vadd.f32 %v885_v41, %v1296_v39  ;;  %v474_v44 = vpop.f32.mrb[1].mxu0  ;;  %v554_v45 = vpop.f32.mrb[1].mxu1 }
 0x1af   : > { %v475_v46 = vadd.f32 %v1296_v39, %v474_v44  ;;  %v555_v47 = vadd.f32 %v1296_v39, %v554_v45 }
 0x1b0   : > { %635 = vst.msk [vmem:[%s1301_s4 + $0x8] sm:$0xff] %vm633_vm1, %v480_v42  ;;  %651 = vst.msk [vmem:[%s1301_s4 + $0x88] sm:$0xff] %vm633_vm1, %v560_v43 }
 0x1b1   : > { %634 = vst.msk [vmem:[%s1301_s4] sm:$0xff] %vm633_vm1, %v475_v46  ;;  %650 = vst.msk [vmem:[%s1301_s4 + $0x80] sm:$0xff] %vm633_vm1, %v555_v47 }
 0x1b5   : > { %v864_v48 = vpop.f32.mrb[2].mxu0  ;;  %v888_v49 = vpop.f32.mrb[2].mxu1 }
 0x1b6   : > { %v490_v50 = vadd.f32 %v864_v48, %v1296_v39  ;;  %v570_v51 = vadd.f32 %v888_v49, %v1296_v39  ;;  %v484_v52 = vpop.f32.mrb[3].mxu0  ;;  %v564_v53 = vpop.f32.mrb[3].mxu1 }
 0x1b7   : > { %v485_v54 = vadd.f32 %v1296_v39, %v484_v52  ;;  %v565_v55 = vadd.f32 %v1296_v39, %v564_v53 }
 0x1b8   : > { %637 = vst.msk [vmem:[%s1301_s4 + $0x18] sm:$0xff] %vm633_vm1, %v490_v50  ;;  %653 = vst.msk [vmem:[%s1301_s4 + $0x98] sm:$0xff] %vm633_vm1, %v570_v51 }
 0x1b9   : > { %636 = vst.msk [vmem:[%s1301_s4 + $0x10] sm:$0xff] %vm633_vm1, %v485_v54  ;;  %652 = vst.msk [vmem:[%s1301_s4 + $0x90] sm:$0xff] %vm633_vm1, %v565_v55 }
 0x1bd   : > { %v867_v56 = vpop.f32.mrb[4].mxu0  ;;  %v891_v57 = vpop.f32.mrb[4].mxu1 }
 0x1be   : > { %v500_v58 = vadd.f32 %v867_v56, %v1296_v39  ;;  %v580_v59 = vadd.f32 %v891_v57, %v1296_v39  ;;  %v494_v60 = vpop.f32.mrb[5].mxu0  ;;  %v574_v61 = vpop.f32.mrb[5].mxu1 }
 0x1bf   : > { %v495_v62 = vadd.f32 %v1296_v39, %v494_v60  ;;  %v575_v63 = vadd.f32 %v1296_v39, %v574_v61 }
 0x1c0   : > { %639 = vst.msk [vmem:[%s1301_s4 + $0x28] sm:$0xff] %vm633_vm1, %v500_v58  ;;  %655 = vst.msk [vmem:[%s1301_s4 + $0xa8] sm:$0xff] %vm633_vm1, %v580_v59 }
 0x1c1   : > { %638 = vst.msk [vmem:[%s1301_s4 + $0x20] sm:$0xff] %vm633_vm1, %v495_v62  ;;  %654 = vst.msk [vmem:[%s1301_s4 + $0xa0] sm:$0xff] %vm633_vm1, %v575_v63 }
 0x1c5   : > { %v870_v0 = vpop.f32.mrb[6].mxu0  ;;  %v894_v1 = vpop.f32.mrb[6].mxu1 }
 0x1c6   : > { %v510_v2 = vadd.f32 %v870_v0, %v1296_v39  ;;  %v590_v3 = vadd.f32 %v894_v1, %v1296_v39  ;;  %v504_v4 = vpop.f32.mrb[7].mxu0  ;;  %v584_v5 = vpop.f32.mrb[7].mxu1 }
 0x1c7   : > { %v505_v6 = vadd.f32 %v1296_v39, %v504_v4  ;;  %v585_v7 = vadd.f32 %v1296_v39, %v584_v5 }
 0x1c8   : > { %641 = vst.msk [vmem:[%s1301_s4 + $0x38] sm:$0xff] %vm633_vm1, %v510_v2  ;;  %657 = vst.msk [vmem:[%s1301_s4 + $0xb8] sm:$0xff] %vm633_vm1, %v590_v3 }
 0x1c9   : > { %640 = vst.msk [vmem:[%s1301_s4 + $0x30] sm:$0xff] %vm633_vm1, %v505_v6  ;;  %656 = vst.msk [vmem:[%s1301_s4 + $0xb0] sm:$0xff] %vm633_vm1, %v585_v7 }
 0x1cd   : > { %v873_v8 = vpop.f32.mrb[8].mxu0  ;;  %v897_v9 = vpop.f32.mrb[8].mxu1 }
 0x1ce   : > { %v520_v10 = vadd.f32 %v873_v8, %v1296_v39  ;;  %v600_v11 = vadd.f32 %v897_v9, %v1296_v39  ;;  %v514_v12 = vpop.f32.mrb[9].mxu0  ;;  %v594_v13 = vpop.f32.mrb[9].mxu1 }
 0x1cf   : > { %v515_v14 = vadd.f32 %v1296_v39, %v514_v12  ;;  %v595_v15 = vadd.f32 %v1296_v39, %v594_v13 }
 0x1d0   : > { %643 = vst.msk [vmem:[%s1301_s4 + $0x48] sm:$0xff] %vm633_vm1, %v520_v10  ;;  %659 = vst.msk [vmem:[%s1301_s4 + $0xc8] sm:$0xff] %vm633_vm1, %v600_v11 }
 0x1d1   : > { %642 = vst.msk [vmem:[%s1301_s4 + $0x40] sm:$0xff] %vm633_vm1, %v515_v14  ;;  %658 = vst.msk [vmem:[%s1301_s4 + $0xc0] sm:$0xff] %vm633_vm1, %v595_v15 }
 0x1d5   : > { %v876_v16 = vpop.f32.mrb[10].mxu0  ;;  %v900_v17 = vpop.f32.mrb[10].mxu1 }
 0x1d6   : > { %v530_v18 = vadd.f32 %v876_v16, %v1296_v39  ;;  %v610_v19 = vadd.f32 %v900_v17, %v1296_v39  ;;  %v524_v20 = vpop.f32.mrb[11].mxu0  ;;  %v604_v21 = vpop.f32.mrb[11].mxu1 }
 0x1d7   : > { %v525_v22 = vadd.f32 %v1296_v39, %v524_v20  ;;  %v605_v23 = vadd.f32 %v1296_v39, %v604_v21 }
 0x1d8   : > { %645 = vst.msk [vmem:[%s1301_s4 + $0x58] sm:$0xff] %vm633_vm1, %v530_v18  ;;  %661 = vst.msk [vmem:[%s1301_s4 + $0xd8] sm:$0xff] %vm633_vm1, %v610_v19 }
 0x1d9   : > { %644 = vst.msk [vmem:[%s1301_s4 + $0x50] sm:$0xff] %vm633_vm1, %v525_v22  ;;  %660 = vst.msk [vmem:[%s1301_s4 + $0xd0] sm:$0xff] %vm633_vm1, %v605_v23 }
 0x1dd   : > { %v879_v24 = vpop.f32.mrb[12].mxu0  ;;  %v903_v25 = vpop.f32.mrb[12].mxu1 }
 0x1de   : > { %v540_v26 = vadd.f32 %v879_v24, %v1296_v39  ;;  %v620_v27 = vadd.f32 %v903_v25, %v1296_v39  ;;  %v534_v28 = vpop.f32.mrb[13].mxu0  ;;  %v614_v29 = vpop.f32.mrb[13].mxu1 }
 0x1df   : > { %v535_v30 = vadd.f32 %v1296_v39, %v534_v28  ;;  %v615_v31 = vadd.f32 %v1296_v39, %v614_v29 }
 0x1e0   : > { %647 = vst.msk [vmem:[%s1301_s4 + $0x68] sm:$0xff] %vm633_vm1, %v540_v26  ;;  %663 = vst.msk [vmem:[%s1301_s4 + $0xe8] sm:$0xff] %vm633_vm1, %v620_v27 }
 0x1e1   : > { %646 = vst.msk [vmem:[%s1301_s4 + $0x60] sm:$0xff] %vm633_vm1, %v535_v30  ;;  %662 = vst.msk [vmem:[%s1301_s4 + $0xe0] sm:$0xff] %vm633_vm1, %v615_v31 }
 0x1e5   : > { %v882_v32 = vpop.f32.mrb[14].mxu0  ;;  %v906_v33 = vpop.f32.mrb[14].mxu1 }
 0x1e6   : > { %v550_v34 = vadd.f32 %v882_v32, %v1296_v39  ;;  %v630_v35 = vadd.f32 %v906_v33, %v1296_v39  ;;  %v544_v36 = vpop.f32.mrb[15].mxu0  ;;  %v624_v37 = vpop.f32.mrb[15].mxu1 }
 0x1e7   : > { %v545_v38 = vadd.f32 %v1296_v39, %v544_v36  ;;  %v625_v40 = vadd.f32 %v1296_v39, %v624_v37 }
 0x1e8   : > { %649 = vst.msk [vmem:[%s1301_s4 + $0x78] sm:$0xff] %vm633_vm1, %v550_v34  ;;  %665 = vst.msk [vmem:[%s1301_s4 + $0xf8] sm:$0xff] %vm633_vm1, %v630_v35 }
 0x1e9   : > { %648 = vst.msk [vmem:[%s1301_s4 + $0x70] sm:$0xff] %vm633_vm1, %v545_v38  ;;  %664 = vst.msk [vmem:[%s1301_s4 + $0xf0] sm:$0xff] %vm633_vm1, %v625_v40 }
 0x1ea PF: > { %s17_s17 = sadd.s32 1, %s1096_s17   ;;  %s1433_s12 = smov %s1080_s13 }
 0x1eb   : > { %p14_p1 = scmp.ge.s32.totalorder %s17_s17, 4   ;;  %s1434_s13 = smov %s1084_s14 }
 0x1ec   : > { %s1435_s14 = smov %s1207_s27  ;;  %s1436_s15 = smov %s1092_s16 }
 0x1ed   : > { %s1437_s16 = smov %s1439_s25  ;;  %16 = sbr.rel (!%p14_p1) target bundleno = 5 (0x5), region = 76 }
 0x1f4   :  { %696 = vsyncpa [#allocation3], 1 }
 0x1f5   :  { %698 = vsyncpa [#allocation3 + $0x1], 1 }
 0x1f6   :  { %699 = vsyncpa [#allocation5], 1 }

</bundles_post_ra>
